<compile_context>
chip_gen: v7x
topology: tpu7x:2x2x1
jax: 0.10.0
libtpu: 0.0.40
codegen_flags: <defaults>
</compile_context>

<pallas_src>
import functools

import jax
import jax.numpy as jnp
from jax.experimental import pallas as pl
from jax.experimental.pallas import tpu as pltpu


def _round_up(v, m):
    return ((v + m - 1) // m) * m


def _vmem_limit_bytes():
    """3/4 of the chip's physical VMEM (conservative 64 MiB fallback)."""
    cap = 64 * 1024 * 1024
    try:
        info = pltpu.get_tpu_info()
        for name in ("vmem_capacity_bytes", "vmem_bytes", "vmem_size_bytes"):
            v = getattr(info, name, None)
            if v:
                cap = int(v)
                break
    except Exception:
        pass
    return (cap * 3) // 4


def _choose_tile(n, f_pad, h_pad, k_pad, vmem_limit):
    """Largest square tile whose K1 working set fits comfortably in VMEM."""
    comfort = (vmem_limit * 3) // 4
    for t in (2048, 1024, 512, 256, 128):
        est = (2 * t * t * 4            # adj block (f32 worst case, dbl-buf)
               + t * t * 2              # in-kernel bf16 copy of the adj block
               + 2 * t * f_pad * 2      # x block (bf16, dbl-buf)
               + 2 * f_pad * h_pad * 2  # W (resident)
               + 2 * k_pad * t * 4      # memb block (f32)
               + 2 * t * h_pad * 2      # z output block (bf16)
               + 2 * k_pad * h_pad * 4  # mu-partial output block
               + t * f_pad * 4)         # adj@x accumulator scratch
        if est > comfort:
            continue
        if t > 128 and _round_up(n, t) > 1.25 * n:
            continue                    # avoid excessive padding waste
        return t
    return 128


def _pad_cast(a, rows, cols, dtype):
    if a.shape == (rows, cols) and a.dtype == dtype:
        return a
    out = jnp.zeros((rows, cols), dtype=dtype)
    return out.at[: a.shape[0], : a.shape[1]].set(a.astype(dtype))


# --------------------------- kernels ----------------------------------------


def _fused_kernel(adj_ref, x_ref, w_ref, memb_ref, z_ref, mu_ref, dist_ref,
                  *, prelu_alpha, eps):
    """Whole forward for a small graph: everything stays resident in VMEM."""
    ax = jnp.dot(adj_ref[...], x_ref[...], preferred_element_type=jnp.float32)
    z = jnp.dot(ax.astype(jnp.bfloat16), w_ref[...],
                preferred_element_type=jnp.float32)
    z = jnp.where(z > 0, z, prelu_alpha * z)
    # rsqrt (EUP) + multiply; eps guards all-zero (padded) rows.
    inv_norm = jax.lax.rsqrt(jnp.sum(z * z, axis=1, keepdims=True) + eps)
    z = z * inv_norm
    z_ref[...] = z
    mu = jnp.dot(memb_ref[...], z, preferred_element_type=jnp.float32)
    mu_ref[...] = mu
    # Contract the hidden axis of mu directly (no materialized transpose).
    dist_ref[...] = jax.lax.dot_general(
        z.astype(jnp.bfloat16), mu.astype(jnp.bfloat16),
        (((1,), (1,)), ((), ())), preferred_element_type=jnp.float32)


def _encode_kernel(adj_ref, x_ref, w_ref, memb_ref, z_ref, mup_ref, ax_ref,
                   *, prelu_alpha, eps):
    """K1: grid (row blocks i, contraction blocks k).

    Accumulate adj@x into an f32 scratch across k; at the last k-step apply
    W / PReLU / row-normalization, store the bf16 z block, and emit this row
    block's mu partial (memb[:, blk] @ z_blk) while z is still in VMEM.
    """
    k = pl.program_id(1)

    @pl.when(k == 0)
    def _():
        ax_ref[...] = jnp.zeros_like(ax_ref)

    ax_ref[...] += jnp.dot(adj_ref[...].astype(jnp.bfloat16), x_ref[...],
                           preferred_element_type=jnp.float32)

    @pl.when(k == pl.num_programs(1) - 1)
    def _():
        z = jnp.dot(ax_ref[...].astype(jnp.bfloat16), w_ref[...],
                    preferred_element_type=jnp.float32)
        z = jnp.where(z > 0, z, prelu_alpha * z)
        inv_norm = jax.lax.rsqrt(jnp.sum(z * z, axis=1, keepdims=True) + eps)
        z = z * inv_norm
        z_ref[...] = z.astype(z_ref.dtype)
        # memb kept in f32 for exact community means (tiny, memory-bound).
        mup_ref[0] = jnp.dot(memb_ref[...], z,
                             preferred_element_type=jnp.float32)


def _dist_kernel(z_ref, mu_ref, dist_ref):
    """K3: dist block = z block @ mu^T (bf16 operands, f32 accumulation)."""
    dist_ref[...] = jax.lax.dot_general(
        z_ref[...], mu_ref[...].astype(jnp.bfloat16),
        (((1,), (1,)), ((), ())),
        preferred_element_type=jnp.float32).astype(dist_ref.dtype)


# --------------------------- wrapper -----------------------------------------


def dgi_forward(x, adj, w_enc, memb, *, cluster_temp=30.0, prelu_alpha=0.25,
                eps=1e-12, block=None, force_tiled=False):
    """Returns (pos_z, mu, r, dist) as in DeepGraphInfomax.forward."""
    N, F = x.shape
    H = w_enc.shape[1]
    K = memb.shape[0]
    f32, bf16 = jnp.float32, jnp.bfloat16

    alpha = float(prelu_alpha)
    eps = float(eps)
    temp = float(cluster_temp)
    vmem_limit = _vmem_limit_bytes()

    F_pad = _round_up(max(F, 1), 128)
    H_pad = _round_up(max(H, 1), 128)
    K_pad = _round_up(max(K, 1), 128)
    N16 = _round_up(N, 16)  # bf16-friendly sublane rounding for the fused path

    fused_est = (2 * N16 * N16 + 6 * N16 * F_pad + 2 * F_pad * H_pad
                 + 4 * K_pad * N16 + 8 * N16 * H_pad + 4 * K_pad * H_pad
                 + 4 * N16 * K_pad)
    use_fused = (not force_tiled) and N <= 1024 and fused_est <= (vmem_limit * 2) // 3

    if use_fused:
        # ---- Fused single-kernel path (small graphs): one launch, no HBM
        # round-trips for z / mu / dist intermediates. ----
        adj_p = _pad_cast(adj, N16, N16, bf16)
        x_p = _pad_cast(x, N16, F_pad, bf16)
        w_p = _pad_cast(w_enc, F_pad, H_pad, bf16)
        memb_p = _pad_cast(memb, K_pad, N16, f32)

        z_p, mu_p, dist_p = pl.pallas_call(
            functools.partial(_fused_kernel, prelu_alpha=alpha, eps=eps),
            out_shape=(jax.ShapeDtypeStruct((N16, H_pad), f32),
                       jax.ShapeDtypeStruct((K_pad, H_pad), f32),
                       jax.ShapeDtypeStruct((N16, K_pad), f32)),
            compiler_params=pltpu.CompilerParams(vmem_limit_bytes=vmem_limit),
        )(adj_p, x_p, w_p, memb_p)

        pos_z = z_p[:N, :H]
        mu = mu_p[:K, :H]
        dist = dist_p[:N, :K]
    else:
        # ---- Tiled path (large graphs). ----
        if block is not None:
            assert block % 128 == 0, "tile override must be a multiple of 128"
            t = int(block)
        else:
            t = _choose_tile(N, F_pad, H_pad, K_pad, vmem_limit)
        tm = tk = t

        if N % t == 0:
            n_pad = N
            # No padding needed: consume the caller's f32 adjacency directly
            # (cast to bf16 in-kernel) -> no extra pad/cast sweep over the
            # largest tensor in the forward.
            adj_in = adj
        else:
            n_pad = _round_up(N, t)
            adj_in = _pad_cast(adj, n_pad, n_pad, bf16)

        x_in = _pad_cast(x, n_pad, F_pad, bf16)
        w_in = _pad_cast(w_enc, F_pad, H_pad, bf16)
        memb_in = _pad_cast(memb, K_pad, n_pad, f32)

        n_i = n_pad // tm
        n_k = n_pad // tk

        # K1: encoder + row normalize + mu partials (i parallel, k reduction).
        z_pad, mu_parts = pl.pallas_call(
            functools.partial(_encode_kernel, prelu_alpha=alpha, eps=eps),
            out_shape=(jax.ShapeDtypeStruct((n_pad, H_pad), bf16),
                       jax.ShapeDtypeStruct((n_i, K_pad, H_pad), f32)),
            grid_spec=pltpu.PrefetchScalarGridSpec(
                num_scalar_prefetch=0, grid=(n_i, n_k),
                in_specs=[
                    pl.BlockSpec((tm, tk), lambda i, k: (i, k)),      # adj
                    pl.BlockSpec((tk, F_pad), lambda i, k: (k, 0)),   # x
                    pl.BlockSpec((F_pad, H_pad), lambda i, k: (0, 0)),  # W
                    pl.BlockSpec((K_pad, tm), lambda i, k: (0, i)),   # memb
                ],
                out_specs=(pl.BlockSpec((tm, H_pad), lambda i, k: (i, 0)),
                           pl.BlockSpec((1, K_pad, H_pad),
                                        lambda i, k: (i, 0, 0))),
                scratch_shapes=[pltpu.VMEM((tm, F_pad), f32)]),
            compiler_params=pltpu.CompilerParams(
                dimension_semantics=("parallel", "arbitrary"),
                vmem_limit_bytes=vmem_limit),
        )(adj_in, x_in, w_in, memb_in)

        # Tiny (n_i, K_pad, H_pad) partial-sum reduction in XLA replaces the
        # old K2 kernel (which re-read all of z from HBM).
        mu_pad = jnp.sum(mu_parts, axis=0)

        # K3: dist = z @ mu^T (row-tiled, bf16 in / bf16 out).
        dist_pad = pl.pallas_call(
            _dist_kernel,
            out_shape=jax.ShapeDtypeStruct((n_pad, K_pad), bf16),
            grid_spec=pltpu.PrefetchScalarGridSpec(
                num_scalar_prefetch=0, grid=(n_i,),
                in_specs=[pl.BlockSpec((tm, H_pad), lambda i: (i, 0)),
                          pl.BlockSpec((K_pad, H_pad), lambda i: (0, 0))],
                out_specs=pl.BlockSpec((tm, K_pad), lambda i: (i, 0))),
            compiler_params=pltpu.CompilerParams(
                dimension_semantics=("parallel",),
                vmem_limit_bytes=vmem_limit),
        )(z_pad, mu_pad)

        pos_z = z_pad[:N, :H].astype(f32)
        mu = mu_pad[:K, :H]
        dist = dist_pad[:N, :K].astype(f32)

    # Softmax over only the K real clusters on the tiny (N, K) sliced dist;
    # this replaces a padded (N, 128) f32 r write from a kernel.
    r = jax.nn.softmax(temp * dist, axis=1)
    return pos_z, mu, r, dist


# --------------------------- example inputs & checks -------------------------


def _build_inputs(key, n_nodes, in_feats, hidden, k_comm):
    k_x, k_a, k_w = jax.random.split(key, 3)
    x = jax.random.normal(k_x, (n_nodes, in_feats), dtype=jnp.float32)

    # Symmetric binary adjacency with self-loops, sym-normalized
    # D^{-1/2} (A + I) D^{-1/2} (standard GCN preprocessing; glue, not kernel).
    a = (jax.random.uniform(k_a, (n_nodes, n_nodes)) < 0.2).astype(jnp.float32)
    a = jnp.maximum(a, a.T)
    a = a * (1.0 - jnp.eye(n_nodes)) + jnp.eye(n_nodes)
    d_inv_sqrt = 1.0 / jnp.sqrt(jnp.sum(a, axis=1))
    adj = (d_inv_sqrt[:, None] * a) * d_inv_sqrt[None, :]

    bound = 1.0 / jnp.sqrt(jnp.float32(in_feats))
    w_enc = jax.random.uniform(k_w, (in_feats, hidden), minval=-bound,
                               maxval=bound, dtype=jnp.float32)

    # Communities: K contiguous groups; memb[k, j] = 1/|comm_k| for j in comm_k.
    size = n_nodes // k_comm
    memb = jnp.zeros((k_comm, n_nodes), dtype=jnp.float32)
    for k in range(k_comm):
        memb = memb.at[k, k * size:(k + 1) * size].set(1.0 / size)
    return x, adj, w_enc, memb


def _reference(x, adj, w_enc, memb, cluster_temp, prelu_alpha):
    z = (adj @ x) @ w_enc
    z = jnp.where(z > 0, z, prelu_alpha * z)
    z = z / jnp.sqrt(jnp.sum(z * z, axis=1, keepdims=True) + 1e-12)
    mu = memb @ z
    dist = z @ mu.T
    r = jax.nn.softmax(cluster_temp * dist, axis=1)
    return z, mu, r, dist


def _check(outs, refs, *, norm_atol):
    pos_z, mu, r, dist = outs
    zr, mur, _, distr = refs
    assert pos_z.shape == zr.shape and mu.shape == mur.shape
    assert r.shape == distr.shape and dist.shape == distr.shape
    for a in (pos_z, mu, r, dist):
        assert bool(jnp.all(jnp.isfinite(a)))
    assert bool(jnp.allclose(jnp.linalg.norm(pos_z, axis=1), 1.0,
                             atol=norm_atol))
    assert bool(jnp.allclose(jnp.sum(r, axis=1), 1.0, atol=1e-5))
    assert bool(jnp.all(r >= 0.0)) and bool(jnp.all(r <= 1.0))
    # bf16 MXU operands in-kernel => loose tolerances; r is not compared
    # elementwise because cluster_temp=30 amplifies tiny dist differences.
    assert bool(jnp.allclose(pos_z, zr, atol=5e-2))
    assert bool(jnp.allclose(mu, mur, atol=5e-2))
    assert bool(jnp.allclose(dist, distr, atol=1e-1))


if __name__ == "__main__":
    k1, k2, k3 = jax.random.split(jax.random.PRNGKey(0), 3)

    # 1) Small graph -> fused single-kernel path (the module's natural scale).
    x, adj, w_enc, memb = _build_inputs(k1, n_nodes=32, in_feats=16,
                                        hidden=32, k_comm=4)
    outs = dgi_forward(x, adj, w_enc, memb, cluster_temp=30.0, prelu_alpha=0.25)
    jax.block_until_ready(outs)
    assert outs[0].shape == (32, 32) and outs[1].shape == (4, 32)
    assert outs[2].shape == (32, 4) and outs[3].shape == (32, 4)
    _check(outs, _reference(x, adj, w_enc, memb, 30.0, 0.25), norm_atol=1e-3)

    # 2) Tiled path, padded bf16 adjacency (N not a multiple of the tile).
    x2, adj2, w2, memb2 = _build_inputs(k2, n_nodes=400, in_feats=16,
                                        hidden=32, k_comm=4)
    outs2 = dgi_forward(x2, adj2, w2, memb2, cluster_temp=30.0,
                        prelu_alpha=0.25, force_tiled=True, block=128)
    jax.block_until_ready(outs2)
    _check(outs2, _reference(x2, adj2, w2, memb2, 30.0, 0.25), norm_atol=1e-2)

    # 3) Tiled path, no-pad fast path (f32 adjacency consumed directly).
    x3, adj3, w3, memb3 = _build_inputs(k3, n_nodes=512, in_feats=16,
                                        hidden=32, k_comm=4)
    outs3 = dgi_forward(x3, adj3, w3, memb3, cluster_temp=30.0,
                        prelu_alpha=0.25, force_tiled=True, block=128)
    jax.block_until_ready(outs3)
    _check(outs3, _reference(x3, adj3, w3, memb3, 30.0, 0.25), norm_atol=1e-2)

    print("KERNEL_OK")
</pallas_src>

<mosaic_0001>
module attributes {stable_mosaic.version = 11 : i64} {
  func.func @_fused_kernel(%arg0: memref<32x32xbf16, #tpu.memory_space<vmem>>, %arg1: memref<32x128xbf16, #tpu.memory_space<vmem>>, %arg2: memref<128x128xbf16, #tpu.memory_space<vmem>>, %arg3: memref<128x32xf32, #tpu.memory_space<vmem>>, %arg4: memref<32x128xf32, #tpu.memory_space<vmem>>, %arg5: memref<128x128xf32, #tpu.memory_space<vmem>>, %arg6: memref<32x128xf32, #tpu.memory_space<vmem>>) attributes {dimension_semantics = [], scalar_prefetch = 0 : i64, scratch_operands = 0 : i64, tpu.core_type = #tpu.core_type<tc>} {
    %c0 = arith.constant 0 : index
    %c0_0 = arith.constant 0 : index
    %0 = vector.load %arg0[%c0, %c0_0] : memref<32x32xbf16, #tpu.memory_space<vmem>>, vector<32x32xbf16>
    %c0_1 = arith.constant 0 : index
    %c0_2 = arith.constant 0 : index
    %1 = vector.load %arg1[%c0_1, %c0_2] : memref<32x128xbf16, #tpu.memory_space<vmem>>, vector<32x128xbf16>
    %cst = arith.constant dense<0.000000e+00> : vector<32x128xf32>
    %2 = tpu.matmul %0, %1, %cst {dimension_numbers = #tpu.dot_dimension_numbers<[1], [0], [0], [1], [0, 0, 1, 1], [], []>} : vector<32x32xbf16>, vector<32x128xbf16>, vector<32x128xf32> -> vector<32x128xf32>
    %3 = arith.truncf %2 : vector<32x128xf32> to vector<32x128xbf16>
    %c0_3 = arith.constant 0 : index
    %c0_4 = arith.constant 0 : index
    %4 = vector.load %arg2[%c0_3, %c0_4] : memref<128x128xbf16, #tpu.memory_space<vmem>>, vector<128x128xbf16>
    %cst_5 = arith.constant dense<0.000000e+00> : vector<32x128xf32>
    %5 = tpu.matmul %3, %4, %cst_5 {dimension_numbers = #tpu.dot_dimension_numbers<[1], [0], [0], [1], [0, 0, 1, 1], [], []>} : vector<32x128xbf16>, vector<128x128xbf16>, vector<32x128xf32> -> vector<32x128xf32>
    %cst_6 = arith.constant 0.000000e+00 : f32
    %6 = vector.broadcast %cst_6 : f32 to vector<32x128xf32>
    %7 = arith.cmpf ogt, %5, %6 : vector<32x128xf32>
    %cst_7 = arith.constant 2.500000e-01 : f32
    %8 = vector.broadcast %cst_7 : f32 to vector<32x128xf32>
    %9 = arith.mulf %8, %5 : vector<32x128xf32>
    %10 = arith.select %7, %5, %9 : vector<32x128xi1>, vector<32x128xf32>
    %11 = arith.mulf %10, %10 : vector<32x128xf32>
    %cst_8 = arith.constant dense<0.000000e+00> : vector<32xf32>
    %12 = vector.multi_reduction <add>, %11, %cst_8 [1] : vector<32x128xf32> to vector<32xf32>
    %13 = vector.shape_cast %12 : vector<32xf32> to vector<32x1xf32>
    %cst_9 = arith.constant 9.99999996E-13 : f32
    %14 = vector.broadcast %cst_9 : f32 to vector<32x1xf32>
    %15 = arith.addf %13, %14 : vector<32x1xf32>
    %16 = math.rsqrt %15 : vector<32x1xf32>
    %17 = vector.broadcast %16 : vector<32x1xf32> to vector<32x128xf32>
    %18 = arith.mulf %10, %17 : vector<32x128xf32>
    %c0_10 = arith.constant 0 : index
    %c0_11 = arith.constant 0 : index
    %19 = vector.load %arg4[%c0_10, %c0_11] : memref<32x128xf32, #tpu.memory_space<vmem>>, vector<32x128xf32>
    tpu.vector_store %arg4[%c0_10, %c0_11], %18 {strides = array<i32>} : memref<32x128xf32, #tpu.memory_space<vmem>>, vector<32x128xf32>,
    %c0_12 = arith.constant 0 : index
    %c0_13 = arith.constant 0 : index
    %20 = vector.load %arg3[%c0_12, %c0_13] : memref<128x32xf32, #tpu.memory_space<vmem>>, vector<128x32xf32>
    %cst_14 = arith.constant dense<0.000000e+00> : vector<128x128xf32>
    %21 = tpu.matmul %20, %18, %cst_14 {dimension_numbers = #tpu.dot_dimension_numbers<[1], [0], [0], [1], [0, 0, 1, 1], [], []>} : vector<128x32xf32>, vector<32x128xf32>, vector<128x128xf32> -> vector<128x128xf32>
    %c0_15 = arith.constant 0 : index
    %c0_16 = arith.constant 0 : index
    %22 = vector.load %arg5[%c0_15, %c0_16] : memref<128x128xf32, #tpu.memory_space<vmem>>, vector<128x128xf32>
    tpu.vector_store %arg5[%c0_15, %c0_16], %21 {strides = array<i32>} : memref<128x128xf32, #tpu.memory_space<vmem>>, vector<128x128xf32>,
    %23 = arith.truncf %18 : vector<32x128xf32> to vector<32x128xbf16>
    %24 = arith.truncf %21 : vector<128x128xf32> to vector<128x128xbf16>
    %cst_17 = arith.constant dense<0.000000e+00> : vector<32x128xf32>
    %25 = tpu.matmul %23, %24, %cst_17 {dimension_numbers = #tpu.dot_dimension_numbers<[1], [1], [0], [0], [0, 0, 1, 0], [], []>} : vector<32x128xbf16>, vector<128x128xbf16>, vector<32x128xf32> -> vector<32x128xf32>
    %c0_18 = arith.constant 0 : index
    %c0_19 = arith.constant 0 : index
    %26 = vector.load %arg6[%c0_18, %c0_19] : memref<32x128xf32, #tpu.memory_space<vmem>>, vector<32x128xf32>
    tpu.vector_store %arg6[%c0_18, %c0_19], %25 {strides = array<i32>} : memref<32x128xf32, #tpu.memory_space<vmem>>, vector<32x128xf32>,
    return
  }
}

</mosaic_0001>

<bundles_post_ra>
// kernel: tpu_custom_call.1
= control target key start
LH: loop header
LB: loop body
LE: loop exit
PB: predicated region body
PF: predicated region fallthrough
CT: control target
= control target key end

     0   :  { %12 = vsyncpa [#allocation3], 0  ;;  %vm53_vm0 = vcmask 261120   ;;  %s1048_s0 = inlined_call_operand.vmem [shape: bf16[32,32], index: 0, kind: input, shape index: {}]   ;;  %s1049_s1 = inlined_call_operand.vmem [shape: bf16[32,128], index: 1, kind: input, shape index: {}]   ;;  %s1050_s2 = inlined_call_operand.vmem [shape: bf16[128,128], index: 2, kind: input, shape index: {}]   ;;  %s1051_s3 = inlined_call_operand.vmem [shape: f32[128,32], index: 3, kind: input, shape index: {}]   ;;  %s1052_s4 = inlined_call_operand.hbm [shape: f32[32,128], index: 4, kind: output, shape index: {0}]   ;;  %s1053_s5 = inlined_call_operand.hbm [shape: f32[128,128], index: 5, kind: output, shape index: {1}]   ;;  %s1054_s6 = inlined_call_operand.hbm [shape: f32[32,128], index: 6, kind: output, shape index: {2}]  }
   0x1   :  { %v766_v0 = vld [vmem:[%s1049_s1] sm:$0xff]   ;;  %v767_v1 = vld [vmem:[%s1049_s1 + $0x8] sm:$0xff]  }
   0x2   :  { %673 = vmatprep.subr.bf16.mxu1 %v766_v0  ;;  %v768_v2 = vld [vmem:[%s1048_s0] sm:$0xff]   ;;  %v769_v4 = vld [vmem:[%s1048_s0 + $0x8] sm:$0xff]  }
   0x3   :  { %674 = vmatpush3.bf16.msra.mxu1 %v766_v0  ;;  %677 = vmatprep.mubr.msk.bf16.mxu1 %vm53_vm0, %v768_v2  ;;  %v770_v3 = vld [vmem:[%s1050_s2] sm:$0xff]   ;;  %v771_v5 = vld [vmem:[%s1050_s2 + $0x8] sm:$0xff]  }
   0x4   :  { %675 = vmatprep.subr.bf16.mxu1 %v767_v1 }
   0x7   :  { %676 = vmatpush3.bf16.msra.mxu1 %v767_v1 }
   0x8   :  { %681 = vmatprep.subr.bf16.mxu1 %v770_v3 }
   0xa   :  { %678 = vmatmul.mubr.msk.bf16.vlgmr.msra.gmra.mrb[0].mxu1 %vm53_vm0, %v769_v4 }
   0xb   :  { %682 = vmatpush3.bf16.msra.mxu1 %v770_v3 }
   0xc   :  { %13 = vsyncpa [#allocation5], 0  ;;  %683 = vmatprep.subr.bf16.mxu1 %v771_v5  ;;  %v772_v6 = vld [vmem:[%s1050_s2 + $0x10] sm:$0xff]   ;;  %v773_v7 = vld [vmem:[%s1050_s2 + $0x18] sm:$0xff]   ;;  %s857_s24 = smov [#allocation2]  }
   0xd   :  { %v774_v8 = vld [vmem:[%s1050_s2 + $0x20] sm:$0xff]   ;;  %v775_v9 = vld [vmem:[%s1050_s2 + $0x28] sm:$0xff]   ;;  %v776_v10 = vld [vmem:[%s1050_s2 + $0x30] sm:$0xff]   ;;  %s557_s25 = sshll.u32 %s857_s24, 4  ;;  %s558_s25 = int_to_ptr.vmem [resolvable:$true] %s557_s25 }
   0xe   :  { %v777_v11 = vld [vmem:[%s1050_s2 + $0x38] sm:$0xff]   ;;  %v264_v34 = vld [vmem:[%s1051_s3] sm:$0xff]  ;;  %v265_v53 = vld [vmem:[%s1051_s3 + $0x8] sm:$0xff] }
   0xf   :  { %684 = vmatpush3.bf16.msra.mxu1 %v771_v5  ;;  %709 = vmatprep.mubr.msk.f32.mxu0 %vm53_vm0, %v264_v34  ;;  %v266_v54 = vld [vmem:[%s1051_s3 + $0x10] sm:$0xff]  ;;  %v267_v55 = vld [vmem:[%s1051_s3 + $0x18] sm:$0xff]  ;;  %v268_v56 = vld [vmem:[%s1051_s3 + $0x20] sm:$0xff] }
  0x10   :  { %685 = vmatprep.subr.bf16.mxu1 %v772_v6  ;;  %v269_v57 = vld [vmem:[%s1051_s3 + $0x28] sm:$0xff]  ;;  %v270_v58 = vld [vmem:[%s1051_s3 + $0x30] sm:$0xff]  ;;  %v271_v59 = vld [vmem:[%s1051_s3 + $0x38] sm:$0xff] }
  0x11   :  { %v272_v60 = vld [vmem:[%s1051_s3 + $0x40] sm:$0xff]  ;;  %v273_v61 = vld [vmem:[%s1051_s3 + $0x48] sm:$0xff]  ;;  %v274_v62 = vld [vmem:[%s1051_s3 + $0x50] sm:$0xff] }
  0x12   :  { %v275_v63 = vld [vmem:[%s1051_s3 + $0x58] sm:$0xff]  ;;  %v276_v0 = vld [vmem:[%s1051_s3 + $0x60] sm:$0xff]  ;;  %v277_v1 = vld [vmem:[%s1051_s3 + $0x68] sm:$0xff] }
  0x13   :  { %686 = vmatpush3.bf16.msra.mxu1 %v772_v6  ;;  %v278_v2 = vld [vmem:[%s1051_s3 + $0x70] sm:$0xff]  ;;  %v279_v3 = vld [vmem:[%s1051_s3 + $0x78] sm:$0xff]  ;;  %s856_s3 = smov [#allocation4]  }
  0x14   :  { %687 = vmatprep.subr.bf16.mxu1 %v773_v7  ;;  %s569_s23 = sshll.u32 %s856_s3, 4  ;;  %s570_s23 = int_to_ptr.vmem [resolvable:$true] %s569_s23 }
  0x15   :  { %s786_s26 = scalar_lea.vmem %s570_s23, 2048  ;;  %p791_p1 = scmp.lt.s32.totalorder %s570_s23, %s570_s23 }
  0x16   :  { %p787_p0 = scmp.ne.s32.totalorder %s570_s23, %s786_s26  ;;  %p792_p2 = scmp.lt.s32.totalorder %s786_s26, %s786_s26 }
  0x17   :  { %688 = vmatpush3.bf16.msra.mxu1 %v773_v7 }
  0x18   :  { %689 = vmatprep.subr.bf16.mxu1 %v774_v8  ;;  %p793_p3 = por %p792_p2, %p791_p1 }
  0x1a   :  { %p794_p4 = pnand %p793_p3, %p787_p0 }
  0x1b   :  { %690 = vmatpush3.bf16.msra.mxu1 %v774_v8 }
  0x1c   :  { %691 = vmatprep.subr.bf16.mxu1 %v775_v9 }
  0x1f   :  { %692 = vmatpush3.bf16.msra.mxu1 %v775_v9 }
  0x20   :  { %693 = vmatprep.subr.bf16.mxu1 %v776_v10 }
  0x23   :  { %694 = vmatpush3.bf16.msra.mxu1 %v776_v10 }
  0x24   :  { %695 = vmatprep.subr.bf16.mxu1 %v777_v11 }
  0x27   :  { %696 = vmatpush3.bf16.msra.mxu1 %v777_v11 }
  0xdd   :  { %v679_v12 = vpop.f32.mrb[0].mxu1 }
  0xde   :  { %v94_v13 = vpop.f32.mrb[1].mxu1 }
  0xdf   :  { %v680_v14 = vpop.f32.mrb[2].mxu1 }
  0xe0   :  { %v110_v15 = vpack.c.bf16 %v680_v14, %v679_v12  ;;  %v97_v16 = vpop.f32.mrb[3].mxu1 }
  0xe1   :  { %v109_v17 = vpack.c.bf16 %v97_v16, %v94_v13 }
  0xe3   :  { %697 = vmatprep.mubr.bf16.mxu1 %v109_v17 }
  0xe4   :  { %698 = vmatmul.mubr.bf16.vlgmr.msra.gmra.mrb[4].mxu1 %v110_v15 }
 0x1b7   :  { %v699_v18 = vpop.f32.mrb[4].mxu1 }
 0x1b8   :  { %v230_v19 = vmul.f32 0.25, %v699_v18  ;;  %v209_v20 = vpop.f32.mrb[5].mxu1  ;;  %vm226_vm1 = vcmp.gt.f32.partialorder %v699_v18, 0.0 }
 0x1b9   :  { %v228_v21 = vmul.f32 0.25, %v209_v20  ;;  %v700_v22 = vpop.f32.mrb[6].mxu1  ;;  %vm224_vm2 = vcmp.gt.f32.partialorder %v209_v20, 0.0 }
 0x1ba   :  { %vm227_vm3 = vcmp.gt.f32.partialorder %v700_v22, 0.0  ;;  %v231_v23 = vmul.f32 0.25, %v700_v22  ;;  %v212_v24 = vpop.f32.mrb[7].mxu1  ;;  %v234_v25 = vsel %vm226_vm1, %v699_v18, %v230_v19 }
 0x1bb   :  { %vm225_vm4 = vcmp.gt.f32.partialorder %v212_v24, 0.0  ;;  %v229_v26 = vmul.f32 0.25, %v212_v24  ;;  %v238_v27 = vmul.f32 %v234_v25, %v234_v25  ;;  %v232_v28 = vsel %vm224_vm2, %v209_v20, %v228_v21 }
 0x1bc   :  { %v236_v29 = vmul.f32 %v232_v28, %v232_v28  ;;  %v235_v30 = vsel %vm227_vm3, %v700_v22, %v231_v23 }
 0x1bd   :  { %v233_v31 = vsel %vm225_vm4, %v212_v24, %v229_v26  ;;  %244 = vadd.xlane.f32.xlu1 %v238_v27  ;;  %v239_v32 = vmul.f32 %v235_v30, %v235_v30 }
 0x1be   :  { %240 = vadd.xlane.f32.xlu0 %v236_v29  ;;  %v237_v33 = vmul.f32 %v233_v31, %v233_v31 }
 0x1c1   :  { %246 = vadd.xlane.f32.xlu1 %v239_v32 }
 0x1c2   :  { %242 = vadd.xlane.f32.xlu0 %v237_v33 }
 0x24a   :  { %v245_v35 = vpop.xlane.xlu1 %244 }
 0x24b   :  { %v250_v36 = vadd.f32 1e-12, %v245_v35  ;;  %v241_v37 = vpop.xlane.xlu0 %240 }
 0x24c   :  { %v248_v38 = vadd.f32 1e-12, %v241_v37 }
 0x24d   :  { %778 = vrsqrt.f32 %v250_v36 }
 0x24e   :  { %780 = vrsqrt.f32 %v248_v38  ;;  %v247_v39 = vpop.xlane.xlu1 %246 }
 0x24f   :  { %v251_v40 = vadd.f32 1e-12, %v247_v39  ;;  %v243_v41 = vpop.xlane.xlu0 %242 }
 0x250   :  { %v249_v42 = vadd.f32 1e-12, %v243_v41 }
 0x251   :  { %782 = vrsqrt.f32 %v251_v40 }
 0x252   :  { %784 = vrsqrt.f32 %v249_v42 }
 0x257   :  { %v779_v43 = vpop.eup %778 }
 0x258   :  { %v781_v44 = vpop.eup %780  ;;  %v258_v45 = vmul.f32 %v779_v43, %v234_v25 }
 0x259   :  { %v256_v46 = vmul.f32 %v781_v44, %v232_v28 }
 0x25a   :  { %262 = vst [vmem:[#allocation2 + $0x10] sm:$0xff] %v258_v45 }
 0x25b   :  { %v783_v47 = vpop.eup %782  ;;  %260 = vst [vmem:[#allocation2] sm:$0xff] %v256_v46 }
 0x25c   :  { %v785_v48 = vpop.eup %784  ;;  %v259_v49 = vmul.f32 %v783_v47, %v235_v30 }
 0x25d   :  { %v257_v50 = vmul.f32 %v785_v48, %v233_v31 }
 0x25e   :  { %263 = vst [vmem:[#allocation2 + $0x18] sm:$0xff] %v259_v49  ;;  %v938_v52 = vpack.c.bf16 %v259_v49, %v258_v45 }
 0x25f   :  { %261 = vst [vmem:[#allocation2 + $0x8] sm:$0xff] %v257_v50  ;;  %v753_v51 = vpack.c.bf16 %v257_v50, %v256_v46 }
 0x261   :  { %754 = vmatprep.subr.bf16.mxu0 %v753_v51 }
 0x262   :  { %756 = vmatpush3.bf16.msra.mxu0 %v753_v51 }
 0x263   :  { %758 = vmatprep.subr.bf16.mxu0 %v938_v52 }
 0x266   :  { %760 = vmatpush3.bf16.msra.mxu0 %v938_v52 }
 0x269   :  { %710 = vmatmul.mubr.msk.f32.vlgmr.msra.gmra.mrb[0].mxu0 %vm53_vm0, %v265_v53 }
 0x26a   :  { %712 = vmatprep.mubr.msk.f32.mxu0 %vm53_vm0, %v266_v54 }
 0x26d   :  { %713 = vmatmul.mubr.msk.f32.gmra.mrb[2].mxu0 %vm53_vm0, %v267_v55 }
 0x26e   :  { %715 = vmatprep.mubr.msk.f32.mxu0 %vm53_vm0, %v268_v56 }
 0x271   :  { %716 = vmatmul.mubr.msk.f32.gmra.mrb[4].mxu0 %vm53_vm0, %v269_v57 }
 0x272   :  { %718 = vmatprep.mubr.msk.f32.mxu0 %vm53_vm0, %v270_v58 }
 0x275   :  { %719 = vmatmul.mubr.msk.f32.gmra.mrb[6].mxu0 %vm53_vm0, %v271_v59 }
 0x276   :  { %721 = vmatprep.mubr.msk.f32.mxu0 %vm53_vm0, %v272_v60 }
 0x279   :  { %722 = vmatmul.mubr.msk.f32.gmra.mrb[8].mxu0 %vm53_vm0, %v273_v61 }
 0x27a   :  { %724 = vmatprep.mubr.msk.f32.mxu0 %vm53_vm0, %v274_v62 }
 0x27d   :  { %725 = vmatmul.mubr.msk.f32.gmra.mrb[10].mxu0 %vm53_vm0, %v275_v63 }
 0x27e   :  { %727 = vmatprep.mubr.msk.f32.mxu0 %vm53_vm0, %v276_v0 }
 0x281   :  { %728 = vmatmul.mubr.msk.f32.gmra.mrb[12].mxu0 %vm53_vm0, %v277_v1 }
 0x282   :  { %730 = vmatprep.mubr.msk.f32.mxu0 %vm53_vm0, %v278_v2 }
 0x285   :  { %731 = vmatmul.mubr.msk.f32.gmra.mrb[14].mxu0 %vm53_vm0, %v279_v3 }
 0x286   :  { %749 = vmatprep.mubr.bf16.mxu0 %v753_v51 }
 0x33c   :  { %v711_v4 = vpop.f32.mrb[0].mxu0 }
 0x33d   :  { %474 = vst [vmem:[#allocation4 + $0x8] sm:$0xff] %v711_v4  ;;  %v394_v5 = vpop.f32.mrb[1].mxu0 }
 0x33e   :  { %473 = vst [vmem:[#allocation4] sm:$0xff] %v394_v5  ;;  %v491_v6 = vpack.c.bf16 %v711_v4, %v394_v5 }
 0x340   :  { %733 = vmatprep.subr.bf16.mxu0 %v491_v6  ;;  %v714_v7 = vpop.f32.mrb[2].mxu0 }
 0x341   :  { %734 = vmatpush3.bf16.xpose.msra.mxu0 %v491_v6  ;;  %476 = vst [vmem:[#allocation4 + $0x18] sm:$0xff] %v714_v7  ;;  %v404_v8 = vpop.f32.mrb[3].mxu0 }
 0x342   :  { %475 = vst [vmem:[#allocation4 + $0x10] sm:$0xff] %v404_v8  ;;  %v492_v9 = vpack.c.bf16 %v714_v7, %v404_v8 }
 0x344   :  { %735 = vmatprep.subr.bf16.mxu0 %v492_v9  ;;  %v717_v10 = vpop.f32.mrb[4].mxu0 }
 0x345   :  { %478 = vst [vmem:[#allocation4 + $0x28] sm:$0xff] %v717_v10  ;;  %v414_v11 = vpop.f32.mrb[5].mxu0 }
 0x346   :  { %477 = vst [vmem:[#allocation4 + $0x20] sm:$0xff] %v414_v11  ;;  %v493_v12 = vpack.c.bf16 %v717_v10, %v414_v11 }
 0x348   :  { %v720_v13 = vpop.f32.mrb[6].mxu0 }
 0x349   :  { %736 = vmatpush3.bf16.xpose.msra.mxu0 %v492_v9  ;;  %480 = vst [vmem:[#allocation4 + $0x38] sm:$0xff] %v720_v13  ;;  %v424_v14 = vpop.f32.mrb[7].mxu0 }
 0x34a   :  { %737 = vmatprep.subr.bf16.mxu0 %v493_v12  ;;  %479 = vst [vmem:[#allocation4 + $0x30] sm:$0xff] %v424_v14  ;;  %v494_v15 = vpack.c.bf16 %v720_v13, %v424_v14 }
 0x34c   :  { %v723_v16 = vpop.f32.mrb[8].mxu0 }
 0x34d   :  { %482 = vst [vmem:[#allocation4 + $0x48] sm:$0xff] %v723_v16  ;;  %v434_v17 = vpop.f32.mrb[9].mxu0 }
 0x34e   :  { %481 = vst [vmem:[#allocation4 + $0x40] sm:$0xff] %v434_v17  ;;  %v495_v18 = vpack.c.bf16 %v723_v16, %v434_v17 }
 0x350   :  { %v726_v19 = vpop.f32.mrb[10].mxu0 }
 0x351   :  { %738 = vmatpush3.bf16.xpose.msra.mxu0 %v493_v12  ;;  %484 = vst [vmem:[#allocation4 + $0x58] sm:$0xff] %v726_v19  ;;  %v444_v20 = vpop.f32.mrb[11].mxu0 }
 0x352   :  { %739 = vmatprep.subr.bf16.mxu0 %v494_v15  ;;  %483 = vst [vmem:[#allocation4 + $0x50] sm:$0xff] %v444_v20  ;;  %v496_v21 = vpack.c.bf16 %v726_v19, %v444_v20 }
 0x354   :  { %v729_v22 = vpop.f32.mrb[12].mxu0 }
 0x355   :  { %486 = vst [vmem:[#allocation4 + $0x68] sm:$0xff] %v729_v22  ;;  %v454_v23 = vpop.f32.mrb[13].mxu0 }
 0x356   :  { %485 = vst [vmem:[#allocation4 + $0x60] sm:$0xff] %v454_v23  ;;  %v497_v24 = vpack.c.bf16 %v729_v22, %v454_v23 }
 0x358   :  { %v732_v25 = vpop.f32.mrb[14].mxu0 }
 0x359   :  { %740 = vmatpush3.bf16.xpose.msra.mxu0 %v494_v15  ;;  %488 = vst [vmem:[#allocation4 + $0x78] sm:$0xff] %v732_v25  ;;  %v464_v26 = vpop.f32.mrb[15].mxu0 }
 0x35a   :  { %741 = vmatprep.subr.bf16.mxu0 %v495_v18  ;;  %487 = vst [vmem:[#allocation4 + $0x70] sm:$0xff] %v464_v26  ;;  %v498_v27 = vpack.c.bf16 %v732_v25, %v464_v26 }
 0x361   :  { %742 = vmatpush3.bf16.xpose.msra.mxu0 %v495_v18 }
 0x362   :  { %743 = vmatprep.subr.bf16.mxu0 %v496_v21 }
 0x369   :  { %744 = vmatpush3.bf16.xpose.msra.mxu0 %v496_v21 }
 0x36a   :  { %745 = vmatprep.subr.bf16.mxu0 %v497_v24 }
 0x371   :  { %746 = vmatpush3.bf16.xpose.msra.mxu0 %v497_v24 }
 0x372   :  { %747 = vmatprep.subr.bf16.mxu0 %v498_v27 }
 0x379   :  { %748 = vmatpush3.bf16.xpose.msra.mxu0 %v498_v27 }
 0x380   :  { %750 = vmatmul.mubr.bf16.vlgmr.msra.gmra.mrb[16].mxu0 %v938_v52 }
 0x381   :  { %797 = shalt.err (!%p794_p4)
}
 0x382   :  { %s798_s29 = scalar_lea.hbm %s1053_s5, 2048 }
 0x383   :  { %p799_p5 = scmp.ne.s32.totalorder %s1053_s5, %s798_s29  ;;  %p802_p6 = scmp.lt.u32.totalorder %s798_s29, %s1053_s5 }
 0x385   :  { %p804_p7 = pnand %p802_p6, %p799_p5 }
 0x387   :  { %807 = shalt.err (!%p804_p7)
}
 0x388   :  { %s858_s9 = smov 128   ;;  %s859_s10 = smov 8  }
 0x389   :  { %575 = dma.vmem_to_hbm [thread:$0]  %s570_s23, 2048, %s1053_s5, [#allocation5], %s858_s9, %s858_s9, %s859_s10  }
 0x38a   :  { %s808_s12 = scalar_lea.vmem %s558_s25, 512  ;;  %p813_p9 = scmp.lt.s32.totalorder %s558_s25, %s558_s25 }
 0x38b   :  { %p809_p8 = scmp.ne.s32.totalorder %s558_s25, %s808_s12  ;;  %p814_p10 = scmp.lt.s32.totalorder %s808_s12, %s808_s12 }
 0x38d   :  { %p815_p11 = por %p814_p10, %p813_p9 }
 0x38f   :  { %p816_p12 = pnand %p815_p11, %p809_p8 }
 0x391   :  { %819 = shalt.err (!%p816_p12)
}
 0x392   :  { %s820_s15 = scalar_lea.hbm %s1052_s4, 512 }
 0x393   :  { %p821_p13 = scmp.ne.s32.totalorder %s1052_s4, %s820_s15  ;;  %p824_p0 = scmp.lt.u32.totalorder %s820_s15, %s1052_s4 }
 0x395   :  { %p826_p1 = pnand %p824_p0, %p821_p13 }
 0x397   :  { %829 = shalt.err (!%p826_p1)
}
 0x398   :  { %563 = dma.vmem_to_hbm [thread:$0]  %s558_s25, 512, %s1052_s4, [#allocation3], %s858_s9, %s858_s9, %s859_s10  }
 0x399   :  { %s860_s20 = smov [#allocation6]  }
 0x39a   :  { %s581_s21 = sshll.u32 %s860_s20, 4  ;;  %s582_s21 = int_to_ptr.vmem [resolvable:$true] %s581_s21 }
 0x39b   :  { %s830_s22 = scalar_lea.vmem %s582_s21, 512  ;;  %p835_p3 = scmp.lt.s32.totalorder %s582_s21, %s582_s21 }
 0x39c   :  { %p831_p2 = scmp.ne.s32.totalorder %s582_s21, %s830_s22  ;;  %p836_p4 = scmp.lt.s32.totalorder %s830_s22, %s830_s22 }
 0x39e   :  { %p837_p5 = por %p836_p4, %p835_p3 }
 0x3a0   :  { %p838_p6 = pnand %p837_p5, %p831_p2 }
 0x453   :  { %v751_v28 = vpop.f32.mrb[16].mxu0 }
 0x454   :  { %550 = vst [vmem:[#allocation6 + $0x10] sm:$0xff] %v751_v28  ;;  %v533_v29 = vpop.f32.mrb[17].mxu0 }
 0x455   :  { %548 = vst [vmem:[#allocation6] sm:$0xff] %v533_v29  ;;  %v752_v30 = vpop.f32.mrb[18].mxu0 }
 0x456   :  { %551 = vst [vmem:[#allocation6 + $0x18] sm:$0xff] %v752_v30  ;;  %v536_v31 = vpop.f32.mrb[19].mxu0 }
 0x457   :  { %549 = vst [vmem:[#allocation6 + $0x8] sm:$0xff] %v536_v31 }
 0x458   :  { %841 = shalt.err (!%p838_p6)
}
 0x459   :  { %s842_s23 = scalar_lea.hbm %s1054_s6, 512 }
 0x45a   :  { %p843_p7 = scmp.ne.s32.totalorder %s1054_s6, %s842_s23  ;;  %p846_p8 = scmp.lt.u32.totalorder %s842_s23, %s1054_s6 }
 0x45c   :  { %p848_p9 = pnand %p846_p8, %p843_p7 }
 0x45e   :  { %851 = shalt.err (!%p848_p9)
}
 0x45f   :  { %587 = dma.vmem_to_hbm [thread:$0]  %s582_s21, 512, %s1054_s6, [#allocation5], %s858_s9, %s858_s9, %s859_s10  }
 0x460   :  { %852 = dma.done.wait [#allocation3], 512  }
 0x461   :  { %853 = vsyncadd [#allocation3], 4294966784 }
 0x462   :  { %854 = dma.done.wait [#allocation5], 2560  }
 0x463   :  { %855 = vsyncadd [#allocation5], 4294964736 }
 0x464   :  { %597 = vsyncpa [#allocation3], 1 }
 0x465   :  { %598 = vsyncpa [#allocation5], 1 }

</bundles_post_ra>
